<compile_context>
chip_gen: v7x
topology: tpu7x:2x2x1
jax: 0.10.0
libtpu: 0.0.40
codegen_flags: <defaults>
</compile_context>

<pallas_src>
import numpy as np

import jax
import jax.numpy as jnp
from jax.experimental import pallas as pl
from jax.experimental.pallas import tpu as pltpu


# ----------------------------------------------------------------------------
# Parameter init (matches LearnableFP8Activation.__init__ exactly)
# ----------------------------------------------------------------------------
def make_fp8_values() -> jnp.ndarray:
    init_vals = [0.0, 0.25, 0.5, 0.75, 1.0, 1.5, 2.0, 3.0, 4.0, 6.0, 8.0,
                 12.0, 16.0, 24.0, 32.0, 48.0, -0.25, -0.5, -0.75, -1.0,
                 -1.5, -2.0, -3.0, -4.0, -6.0, -8.0, -12.0, -16.0, -24.0,
                 -32.0, -48.0, -64.0]
    all_vals = sorted(set(init_vals + [float(i) for i in range(-128, 128)]))
    return jnp.asarray(all_vals[:256], dtype=jnp.float32)  # (256,)


def _cdiv(a: int, b: int) -> int:
    return -(-a // b)


def _round_up(a: int, b: int) -> int:
    return _cdiv(a, b) * b


# ----------------------------------------------------------------------------
# Pallas kernel factory: sigmoid + nearest-value quantization (static scan)
# ----------------------------------------------------------------------------
def _make_kernel(cand_vals, cand_mids):
    # cand_vals: python floats, the (count+1) codebook values that can be the
    #            nearest neighbor of any y in [0, 1] (sorted ascending)
    # cand_mids: python floats, the count midpoints between consecutive cand_vals
    def kernel(x_ref, o_ref):
        # Load in original dtype, compute in f32.
        x = x_ref[...].astype(jnp.float32)
        # torch.nn.Sigmoid via tanh identity (EUP slot, no f32 divide).
        y = 0.5 * jnp.tanh(0.5 * x) + 0.5
        # Running nearest value; init at the largest codebook value <= 0 is
        # equivalent to the full midpoint scan because y >= 0.
        best = jnp.full(y.shape, cand_vals[0], dtype=jnp.float32)
        for j in range(len(cand_mids)):
            # strict '>' == ties go to the lower value (STEQuantize semantics)
            best = jnp.where(y > cand_mids[j], cand_vals[j + 1], best)
        o_ref[...] = best.astype(o_ref.dtype)

    return kernel


# ----------------------------------------------------------------------------
# Wrapper
# ----------------------------------------------------------------------------
def fp8_sigmoid(x: jnp.ndarray, fp8_values: jnp.ndarray,
                *, block_rows: int = 1024) -> jnp.ndarray:
    """Forward pass of FP8Sigmoid. Returns array of same shape/dtype as x."""
    # ---- static (host-side) codebook analysis: codebook is a concrete param.
    vals_np = np.sort(np.asarray(fp8_values, dtype=np.float32))      # (256,)
    n_vals = int(vals_np.shape[0])
    mids_np = (vals_np[:-1] + vals_np[1:]) * 0.5                     # (255,)
    # sigmoid output is in [0, 1]: only codebook values in [start, end] can be
    # nearest, so only midpoints j in [start, end-1] need to be scanned.
    start = int(np.searchsorted(vals_np, np.float32(0.0), side="right")) - 1
    start = max(0, min(start, n_vals - 1))
    end = int(np.searchsorted(vals_np, np.float32(1.0), side="left"))
    end = min(end, n_vals - 1)
    count = max(end - start, 0)
    cand_vals = [float(v) for v in vals_np[start:start + count + 1]]
    cand_mids = [float(m) for m in mids_np[start:start + count]]

    orig_shape, orig_dtype = x.shape, x.dtype
    lanes = 128
    itemsize = jnp.dtype(orig_dtype).itemsize
    sub = {4: 8, 2: 16, 1: 32}.get(itemsize, 8)   # sublane packing multiple

    # ---- lane-dense 2D slab in the ORIGINAL dtype (casts happen in-kernel).
    flat = x.reshape(-1)
    n = flat.shape[0]
    n_pad = _round_up(n, lanes)
    if n_pad != n:                                # tiny pad only for the last <128 lanes
        flat = jnp.pad(flat, (0, n_pad - n))
    rows = n_pad // lanes
    x2d = flat.reshape(rows, lanes)

    # ---- block size: large blocks for HBM roofline, partial last block is OK.
    br = min(_round_up(block_rows, sub), _round_up(rows, sub))
    if rows >= 2 * sub and _cdiv(rows, br) < 2:
        # keep >= 2 grid steps (v7x megacore split / pipeline overlap)
        br = _round_up(_cdiv(rows, 2), sub)
    br = max(br, sub)
    grid_len = _cdiv(rows, br)

    kernel = _make_kernel(cand_vals, cand_mids)
    out2d = pl.pallas_call(
        kernel,
        out_shape=jax.ShapeDtypeStruct((rows, lanes), orig_dtype),
        grid=(grid_len,),
        in_specs=[pl.BlockSpec((br, lanes), lambda i: (i, 0))],
        out_specs=pl.BlockSpec((br, lanes), lambda i: (i, 0)),
        compiler_params=pltpu.CompilerParams(
            dimension_semantics=("parallel",)),
    )(x2d)

    out = out2d.reshape(-1)
    if n_pad != n:
        out = out[:n]
    return out.reshape(orig_shape)


# ----------------------------------------------------------------------------
# Pure-JAX reference (mirrors torch sigmoid + STEQuantize.forward)
# ----------------------------------------------------------------------------
def _reference(x: jnp.ndarray, fp8_values: jnp.ndarray) -> jnp.ndarray:
    sorted_vals = jnp.sort(fp8_values.astype(jnp.float32))
    y = 1.0 / (1.0 + jnp.exp(-x.astype(jnp.float32)))
    idx = jnp.searchsorted(sorted_vals, y, side="left")
    idx = jnp.clip(idx, 1, sorted_vals.shape[0] - 1)
    high = sorted_vals[idx]
    low = sorted_vals[idx - 1]
    return jnp.where(jnp.abs(y - low) <= jnp.abs(y - high), low, high).astype(x.dtype)


# ----------------------------------------------------------------------------
# Demo
# ----------------------------------------------------------------------------
if __name__ == "__main__":
    key = jax.random.PRNGKey(0)
    x = jax.random.normal(key, (2, 4, 16, 16), dtype=jnp.float32) * 6.0  # NCHW

    fp8_values = make_fp8_values()  # deterministic (256,) parameter

    out = fp8_sigmoid(x, fp8_values)
    out = jax.block_until_ready(out)

    assert out.shape == x.shape and out.dtype == x.dtype

    ref = _reference(x, fp8_values)
    match = float(jnp.mean((out == ref).astype(jnp.float32)))
    max_err = float(jnp.max(jnp.abs(out - ref)))
    # Tolerance: tanh-form vs exp-form sigmoid may differ by a few ULPs; an
    # input landing exactly on a quantization midpoint can flip by one bin
    # (<= 0.25 in the [0,1] candidate range).  Allow a handful of such flips.
    assert match >= 0.99 and max_err <= 0.26, (match, max_err)

    print("KERNEL_OK")
</pallas_src>

<mosaic_0001>
module attributes {stable_mosaic.version = 11 : i64} {
  func.func @kernel(%arg0: i32, %arg1: memref<8x128xf32, #tpu.memory_space<vmem>>, %arg2: memref<8x128xf32, #tpu.memory_space<vmem>>) attributes {dimension_semantics = [#tpu.dimension_semantics<parallel>], iteration_bounds = array<i64: 2>, scalar_prefetch = 0 : i64, scratch_operands = 0 : i64, tpu.core_type = #tpu.core_type<tc>, window_params = [{transform_indices = @transform_0, window_bounds = array<i64: 8, 128>}, {transform_indices = @transform_1, window_bounds = array<i64: 8, 128>}]} {
    %c0 = arith.constant 0 : index
    %c0_0 = arith.constant 0 : index
    %0 = vector.load %arg1[%c0, %c0_0] : memref<8x128xf32, #tpu.memory_space<vmem>>, vector<8x128xf32>
    %cst = arith.constant 5.000000e-01 : f32
    %1 = vector.broadcast %cst : f32 to vector<8x128xf32>
    %2 = arith.mulf %1, %0 : vector<8x128xf32>
    %3 = math.tanh %2 : vector<8x128xf32>
    %cst_1 = arith.constant 5.000000e-01 : f32
    %4 = vector.broadcast %cst_1 : f32 to vector<8x128xf32>
    %5 = arith.mulf %4, %3 : vector<8x128xf32>
    %cst_2 = arith.constant 5.000000e-01 : f32
    %6 = vector.broadcast %cst_2 : f32 to vector<8x128xf32>
    %7 = arith.addf %5, %6 : vector<8x128xf32>
    %cst_3 = arith.constant 0.000000e+00 : f32
    %8 = vector.broadcast %cst_3 : f32 to vector<8x128xf32>
    %cst_4 = arith.constant 1.250000e-01 : f32
    %9 = vector.broadcast %cst_4 : f32 to vector<8x128xf32>
    %10 = arith.cmpf ogt, %7, %9 : vector<8x128xf32>
    %cst_5 = arith.constant 2.500000e-01 : f32
    %11 = vector.broadcast %cst_5 : f32 to vector<8x128xf32>
    %12 = arith.select %10, %11, %8 : vector<8x128xi1>, vector<8x128xf32>
    %cst_6 = arith.constant 3.750000e-01 : f32
    %13 = vector.broadcast %cst_6 : f32 to vector<8x128xf32>
    %14 = arith.cmpf ogt, %7, %13 : vector<8x128xf32>
    %cst_7 = arith.constant 5.000000e-01 : f32
    %15 = vector.broadcast %cst_7 : f32 to vector<8x128xf32>
    %16 = arith.select %14, %15, %12 : vector<8x128xi1>, vector<8x128xf32>
    %cst_8 = arith.constant 6.250000e-01 : f32
    %17 = vector.broadcast %cst_8 : f32 to vector<8x128xf32>
    %18 = arith.cmpf ogt, %7, %17 : vector<8x128xf32>
    %cst_9 = arith.constant 7.500000e-01 : f32
    %19 = vector.broadcast %cst_9 : f32 to vector<8x128xf32>
    %20 = arith.select %18, %19, %16 : vector<8x128xi1>, vector<8x128xf32>
    %cst_10 = arith.constant 8.750000e-01 : f32
    %21 = vector.broadcast %cst_10 : f32 to vector<8x128xf32>
    %22 = arith.cmpf ogt, %7, %21 : vector<8x128xf32>
    %cst_11 = arith.constant 1.000000e+00 : f32
    %23 = vector.broadcast %cst_11 : f32 to vector<8x128xf32>
    %24 = arith.select %22, %23, %20 : vector<8x128xi1>, vector<8x128xf32>
    %c0_12 = arith.constant 0 : index
    %c0_13 = arith.constant 0 : index
    %25 = vector.load %arg2[%c0_12, %c0_13] : memref<8x128xf32, #tpu.memory_space<vmem>>, vector<8x128xf32>
    tpu.vector_store %arg2[%c0_12, %c0_13], %24 {strides = array<i32>} : memref<8x128xf32, #tpu.memory_space<vmem>>, vector<8x128xf32>,
    return
  }
  func.func @transform_0(%arg0: i32) -> (i32, i32) {
    %c0_i32 = arith.constant 0 : i32
    %c0_i32_0 = arith.constant 0 : i32
    return %arg0, %c0_i32 : i32, i32
  }
  func.func @transform_1(%arg0: i32) -> (i32, i32) {
    %c0_i32 = arith.constant 0 : i32
    %c0_i32_0 = arith.constant 0 : i32
    return %arg0, %c0_i32 : i32, i32
  }
}

</mosaic_0001>

<bundles_post_ra>
// kernel: tpu_custom_call.1
= control target key start
LH: loop header
LB: loop body
LE: loop exit
PB: predicated region body
PF: predicated region fallthrough
CT: control target
= control target key end

     0   :  { %6 = vsyncpa [#allocation3], 0  ;;  %s563_s0 = inlined_call_operand.hbm [shape: f32[16,128], index: 0, kind: input, shape index: {}]   ;;  %s564_s1 = inlined_call_operand.hbm [shape: f32[16,128], index: 1, kind: output, shape index: {}]  }
   0x1   :  { %8 = vsyncpa [#allocation3 + $0x1], 0 }
   0x2   :  { %9 = vsyncpa [#allocation4], 0 }
   0x3   :  { %11 = vsyncpa [#allocation4 + $0x1], 0  ;;  %s402_s6 = smov 0   ;;  %s404_s7 = smov 0  }
   0x4   :  { %s406_s8 = smov 0   ;;  %s408_s9 = smov 0  }
   0x5 LB: > { %s423_s10 = sadd.s32 4294967295, %s387_s9   ;;  %s230_s11 = sadd.s32 4294967294, %s387_s9   ;;  %s387_s9 = sphi %s408_s9, %s579_s9   ;;  %s383_s8 = sphi %s406_s8, %s578_s8   ;;  %s379_s7 = sphi %s404_s7, %s577_s7   ;;  %s375_s6 = sphi %s402_s6, %s576_s6  }
   0x6   : > { %s427_s12 = sadd.s32 1, %s387_s9   ;;  %s24_s13 = sadd.s32 1, %s383_s8 }
   0x7   : > { %s21_s14 = ssub.s32 %s387_s9, %s427_s12  ;;  %p31_p0 = scmp.ne.s32.totalorder %s383_s8, %s379_s7 }
   0x8   : > { %p22_p1 = scmp.eq.s32.totalorder %s21_s14, 0  ;;  %p32_p2 = scmp.eq.s32.totalorder %s387_s9, 0 }
   0x9   : > { %p37_p3 = scmp.ne.s32.totalorder %s379_s7, %s375_s6  ;;  %p38_p4 = scmp.eq.s32.totalorder %s423_s10, 0 }
   0xa   : > { %s439_s15 = scalar_select %p22_p1, %s383_s8, %s24_s13  }
   0xb   : > { %p441_p5 = por %p32_p2, %p31_p0  ;;  %p445_p6 = por %p38_p4, %p37_p3 }
   0xc   : > { %p61_p7 = scmp.eq.s32.totalorder %s423_s10, 1  ;;  %p67_p8 = scmp.eq.s32.totalorder %s230_s11, 1 }
   0xd   : > { %p254_p10 = scmp.lt.s32.totalorder %s387_s9, 2  ;;  %s87_s20 = sand.u32 1, %s383_s8  }
   0xe   : > { %p452_p11 = por %p61_p7, %p31_p0  ;;  %p456_p12 = por %p67_p8, %p37_p3 }
   0xf   : > { %s234_s21 = sshll.u32 %s387_s9, 7  ;;  %s233_s22 = sshll.u32 %s87_s20, 3 }
  0x10   : > { %s568_s18 = scalar_select %p452_p11, 1, 0 }
  0x11   : > { %s569_s19 = scalar_select %p456_p12, 1, 0 }
  0x12   : > { %s465_s25 = scalar_lea.hbm %s563_s0, %s234_s21  ;;  %s91_s26 = scalar_lea.vmem [#allocation2], %s233_s22 }
  0x13   : > { %s98_s27 = sshll.u32 %s91_s26, 4  ;;  %p469_p13 = pnand %p254_p10, %p441_p5  ;;  %s473_s27 = int_to_ptr.vmem [resolvable:$true] %s98_s27 }
  0x14   : > { %s88_s29 = scalar_lea.sflag [#allocation3], %s87_s20  ;;  %s291_s30 = scalar_lea.hbm %s465_s25, 128 }
  0x15   : > { %p292_p2 = scmp.ne.s32.totalorder %s465_s25, %s291_s30  ;;  %p293_p3 = pneg %p469_p13 }
  0x16   : > { %s296_s4 = scalar_lea.hbm %s563_s0, 256  ;;  %p297_p5 = scmp.lt.u32.totalorder %s465_s25, %s563_s0 }
  0x17   : > { %p294_p4 = pnand %p293_p3, %p292_p2  ;;  %p298_p8 = scmp.lt.u32.totalorder %s296_s4, %s291_s30 }
  0x18   : > { %p300_p9 = scmp.lt.u32.totalorder %s291_s30, %s465_s25 }
  0x19   : > { %p295_p7 = pneg %p294_p4  ;;  %p299_p10 = por %p298_p8, %p297_p5 }
  0x1b   : > { %p301_p0 = por %p300_p9, %p299_p10 }
  0x1d   : > { %p302_p1 = pnand %p301_p0, %p295_p7 }
  0x1f   : > { %305 = shalt.err (!%p302_p1)
}
  0x20   : > { %s306_s13 = scalar_lea.vmem %s473_s27, 128  ;;  %s389_s14 = smov [#allocation2]  }
  0x21   : > { %p307_p2 = scmp.ne.s32.totalorder %s473_s27, %s306_s13  ;;  %s311_s16 = sshll.u32 %s389_s14, 4  ;;  %s312_s16 = int_to_ptr.vmem [resolvable:$false] %s311_s16 }
  0x22   : > { %s313_s20 = scalar_lea.vmem %s312_s16, 256  ;;  %p314_p11 = scmp.lt.s32.totalorder %s473_s27, %s312_s16 }
  0x23   : > { %p309_p4 = pnand %p307_p2, %p293_p3  ;;  %p315_p5 = scmp.lt.s32.totalorder %s313_s20, %s306_s13 }
  0x25   : > { %p310_p12 = pneg %p309_p4  ;;  %p316_p8 = por %p315_p5, %p314_p11 }
  0x27   : > { %p317_p9 = pnand %p316_p8, %p310_p12 }
  0x29   : > { %320 = shalt.err (!%p317_p9)
}
  0x2a   : > { %249 = dma.hbm_to_vmem [thread:$0]  (!%p469_p13), %s465_s25, 128, %s473_s27, %s88_s29  }
  0x2b   : > { %p571_p0 = scmp.lt.s32.totalorder %s387_s9, 3  ;;  %p572_p1 = scmp.ge.s32.totalorder %s387_s9, 1 }
  0x2d   : > { %p104_p3 = pnand %p572_p1, %p571_p0 }
  0x2e   : > { %s507_s21 = sand.u32 (!%p104_p3), 1, %s379_s7  }
  0x2f   : > { %107 = sbr.rel (%p104_p3) target bundleno = 92 (0x5c), region = 24  ;;  %s236_s22 = sshll.u32 (!%p104_p3), %s507_s21, 3 }
  0x30   : > { %s110_s23 = scalar_lea.sflag (!%p104_p3), [#allocation3], %s507_s21  ;;  %s113_s24 = scalar_lea.vmem (!%p104_p3), [#allocation2], %s236_s22 }
  0x36   : > { %366 = dma.done.wait (%p445_p6), %s110_s23, 128  }
  0x37   : > { %368 = vsyncadd (%p445_p6), %s110_s23, 4294967168  ;;  %v132_v0 = vld [vmem:[%s113_s24] sm:$0xff]  ;;  %s131_s25 = scalar_lea.vmem [#allocation5], %s236_s22  ;;  %s239_s27 = sshll.u32 %s423_s10, 7  ;;  %v390_v5 = vmov 0.0  }
  0x38   : > { %v133_v1 = vmul.f32 0.5, %v132_v0  ;;  %s160_s26 = sshll.u32 %s131_s25, 4  ;;  %s521_s29 = scalar_lea.hbm %s564_s1, %s239_s27  ;;  %s516_s26 = int_to_ptr.vmem [resolvable:$true] %s160_s26 }
  0x39   : > { %s147_s30 = scalar_lea.sflag [#allocation4], %s507_s21  ;;  %s321_s2 = scalar_lea.vmem %s516_s26, 128 }
  0x3a   : > { %289 = vtanh.f32 %v133_v1  ;;  %p322_p6 = scmp.ne.s32.totalorder %s516_s26, %s321_s2  ;;  %p573_p11 = scmp.ne.s32.totalorder %s568_s18, 0 }
  0x3b   : > { %s391_s10 = smov [#allocation5]  }
  0x3c   : > { %p323_p12 = pnand %p322_p6, %p573_p11  ;;  %s325_s3 = sshll.u32 %s391_s10, 4  ;;  %s326_s3 = int_to_ptr.vmem [resolvable:$false] %s325_s3 }
  0x3d   : > { %s327_s4 = scalar_lea.vmem %s326_s3, 256  ;;  %p328_p7 = scmp.lt.s32.totalorder %s516_s26, %s326_s3 }
  0x3e   : > { %p324_p13 = pneg %p323_p12  ;;  %p329_p10 = scmp.lt.s32.totalorder %s327_s4, %s321_s2 }
  0x40   : > { %p330_p2 = por %p329_p10, %p328_p7 }
  0x42   : > { %p331_p4 = pnand %p330_p2, %p324_p13 }
  0x44   : > { %v290_v2 = vpop.eup %289 }
  0x45   : > { %v135_v3 = vmul.f32 0.5, %v290_v2 }
  0x47   : > { %v136_v4 = vadd.f32 0.5, %v135_v3 }
  0x49   : > { %vm137_vm0 = vcmp.gt.f32.partialorder %v136_v4, 0.125  ;;  %vm139_vm1 = vcmp.gt.f32.partialorder %v136_v4, 0.375  ;;  %vm141_vm2 = vcmp.gt.f32.partialorder %v136_v4, 0.625  ;;  %vm143_vm3 = vcmp.gt.f32.partialorder %v136_v4, 0.875 }
  0x4a   : > { %v138_v6 = vsel %vm137_vm0, 0.25, %v390_v5 }
  0x4b   : > { %v140_v7 = vsel %vm139_vm1, 0.5, %v138_v6 }
  0x4c   : > { %v142_v8 = vsel %vm141_vm2, 0.75, %v140_v7 }
  0x4d   : > { %v144_v9 = vsel %vm143_vm3, 1.0, %v142_v8 }
  0x4e   : > { %145 = vst [vmem:[%s131_s25] sm:$0xff] %v144_v9 }
  0x4f   : > { %334 = shalt.err (!%p331_p4)
}
  0x50   : > { %s335_s5 = scalar_lea.hbm %s521_s29, 128  ;;  %s339_s14 = scalar_lea.hbm %s564_s1, 256 }
  0x51   : > { %p336_p5 = scmp.ne.s32.totalorder %s521_s29, %s335_s5  ;;  %p340_p0 = scmp.lt.u32.totalorder %s521_s29, %s564_s1 }
  0x52   : > { %p341_p1 = scmp.lt.u32.totalorder %s339_s14, %s335_s5  ;;  %p343_p6 = scmp.lt.u32.totalorder %s335_s5, %s521_s29 }
  0x53   : > { %p337_p8 = pnand %p336_p5, %p573_p11 }
  0x54   : > { %p342_p3 = por %p341_p1, %p340_p0 }
  0x55   : > { %p338_p9 = pneg %p337_p8 }
  0x56   : > { %p344_p12 = por %p343_p6, %p342_p3 }
  0x58   : > { %p345_p13 = pnand %p344_p12, %p338_p9 }
  0x5a   : > { %348 = shalt.err (!%p345_p13)
}
  0x5b   : > { %244 = dma.vmem_to_hbm [thread:$0]  (%p573_p11), %s516_s26, 128, %s521_s29, %s147_s30  }
  0x5c PF: > { %s172_s21 = sand.u32 1, %s375_s6   ;;  %p574_p7 = scmp.ne.s32.totalorder %s569_s19, 0 }
  0x5d   : > { %p575_p10 = scmp.ge.s32.totalorder %s387_s9, 2  ;;  %s173_s22 = scalar_lea.sflag [#allocation4], %s172_s21 }
  0x5f   : > { %p251_p2 = pnand %p575_p10, %p574_p7 }
  0x61   : > { %370 = dma.done.wait (!%p251_p2), %s173_s22, 128  }
  0x62   : > { %372 = vsyncadd (!%p251_p2), %s173_s22, 4294967168  ;;  %p14_p4 = scmp.ge.s32.totalorder %s427_s12, 4   ;;  %s576_s6 = smov %s379_s7 }
  0x63   : > { %s577_s7 = smov %s383_s8  ;;  %s578_s8 = smov %s439_s15 }
  0x64   : > { %s579_s9 = smov %s427_s12  ;;  %16 = sbr.rel (!%p14_p4) target bundleno = 5 (0x5), region = 69 }
  0x6b   :  { %178 = vsyncpa [#allocation3], 1 }
  0x6c   :  { %180 = vsyncpa [#allocation3 + $0x1], 1 }
  0x6d   :  { %181 = vsyncpa [#allocation4], 1 }
  0x6e   :  { %183 = vsyncpa [#allocation4 + $0x1], 1 }

</bundles_post_ra>
